<compile_context>
chip_gen: v6e
topology: v6e:2x2x1
jax: 0.10.0
libtpu: 0.0.40
codegen_flags: <defaults>
</compile_context>

<pallas_src>
import jax
import jax.numpy as jnp
from jax.experimental import pallas as pl
from jax.experimental.pallas import tpu as pltpu


# ----------------------------- Pallas kernel ------------------------------ #
def _attention_block_kernel(g_ref, x_ref, wgT_ref, wxT_ref, b_ref,
                            wpsi_ref, bpsi_ref, o_ref):
    # g_ref:    (F_g,  T)     x_ref:    (F_l, T)      (T = pixel tile, lanes)
    # wgT_ref:  (F_int, F_g)  wxT_ref:  (F_int, F_l)  (BN folded in)
    # b_ref:    (F_int, 1)    -- folded bg + bx, added once
    # wpsi_ref: (F_int, 1)    bpsi_ref: (1,) scalar in SMEM
    # o_ref:    (F_l, T)
    x = x_ref[...]
    # Both 1x1 convs accumulate into one f32 register value (single bias add).
    t = (jnp.dot(wgT_ref[...], g_ref[...], preferred_element_type=jnp.float32)
         + jnp.dot(wxT_ref[...], x, preferred_element_type=jnp.float32)
         + b_ref[...])
    t = jnp.maximum(t, 0.0)                                       # ReLU
    # 1x1 conv to a single channel == sublane reduction over F_int (XLU).
    psi_lin = jnp.sum(t * wpsi_ref[...], axis=0, keepdims=True) + bpsi_ref[0]
    psi = jax.nn.sigmoid(psi_lin)                                  # (1, T) f32
    # Multiply in the input dtype (psi cast once); lane-dense store.
    o_ref[...] = (x * psi.astype(x.dtype)).astype(o_ref.dtype)


# --------------------------- tile-size heuristic --------------------------- #
def _round_up(v, m):
    return -(-v // m) * m


def _choose_tile_hw(n, hw, f_g, f_l, *, desired=2048,
                    vmem_budget_bytes=24 << 20, min_grid_steps=8):
    """Lane-dense pixel tile: multiple of 128, large enough to amortize the
    ~0.35us/step overhead, small enough for v7x's 64 MiB VMEM and for the
    grid to keep >= min_grid_steps steps (feeds both v7x TensorCores)."""
    t = min(desired, _round_up(hw, 128))
    # double-buffered f32 g/x/out tiles must stay inside a conservative budget
    per_pixel_bytes = (f_g + 2 * f_l) * 4 * 2
    t = min(t, max(128, (vmem_budget_bytes // per_pixel_bytes) // 128 * 128))
    # keep the grid long enough for megacore sharding
    t_for_steps = max(128, _round_up(-(-(n * hw) // min_grid_steps), 128))
    t = min(t, t_for_steps)
    return max(128, t)


# ------------------------------ pallas_call -------------------------------- #
def _attention_block_pallas(g3, x3, wgT, wxT, b_col, wpsi_col, bpsi,
                            *, tile_hw):
    N, F_g, HWp = g3.shape
    _, F_l, _ = x3.shape
    F_int = wgT.shape[0]
    assert HWp % tile_hw == 0

    grid = (N, HWp // tile_hw)
    return pl.pallas_call(
        _attention_block_kernel,
        out_shape=jax.ShapeDtypeStruct((N, F_l, HWp), x3.dtype),
        grid=grid,
        in_specs=[
            pl.BlockSpec((None, F_g, tile_hw), lambda n, j: (n, 0, j)),   # g
            pl.BlockSpec((None, F_l, tile_hw), lambda n, j: (n, 0, j)),   # x
            pl.BlockSpec((F_int, F_g), lambda n, j: (0, 0)),              # W_g^T
            pl.BlockSpec((F_int, F_l), lambda n, j: (0, 0)),              # W_x^T
            pl.BlockSpec((F_int, 1), lambda n, j: (0, 0)),                # bg+bx
            pl.BlockSpec((F_int, 1), lambda n, j: (0, 0)),                # W_psi
            pl.BlockSpec(memory_space=pltpu.MemorySpace.SMEM),            # b_psi
        ],
        out_specs=pl.BlockSpec((None, F_l, tile_hw), lambda n, j: (n, 0, j)),
        compiler_params=pltpu.CompilerParams(
            dimension_semantics=("parallel", "parallel"),
            vmem_limit_bytes=64 * 1024 * 1024),
    )(g3, x3, wgT, wxT, b_col, wpsi_col, bpsi)


# ------------------------------ JAX wrapper -------------------------------- #
def _fold_bn(w, b, gamma, beta, mean, var, eps=1e-5):
    """Fold eval-mode BatchNorm into a 1x1 conv.  w: (C_in, C_out), b: (C_out,)."""
    s = gamma / jnp.sqrt(var + eps)
    return w * s[None, :], b * s + (beta - mean * s)


def attention_block(g, x, params, *, tile_hw=None):
    """g: (N, F_g, H, W), x: (N, F_l, H, W) in NCHW.  Returns (N, F_l, H, W)."""
    N, F_g, H, W = g.shape
    _, F_l, _, _ = x.shape

    wg, bg = _fold_bn(params["wg"], params["bg"], *params["bn_g"])
    wx, bx = _fold_bn(params["wx"], params["bx"], *params["bn_x"])
    wpsi, bpsi = _fold_bn(params["wpsi"], params["bpsi"], *params["bn_psi"])
    F_int = wg.shape[1]

    hw = H * W
    # Free reshapes (NCHW is contiguous over H*W); no NCHW<->NHWC transposes.
    g3 = g.reshape(N, F_g, hw)
    x3 = x.reshape(N, F_l, hw)

    if tile_hw is None:
        tile_hw = _choose_tile_hw(N, hw, F_g, F_l)
    hw_pad = _round_up(hw, tile_hw)
    if hw_pad != hw:
        pad = ((0, 0), (0, 0), (0, hw_pad - hw))
        g3 = jnp.pad(g3, pad)
        x3 = jnp.pad(x3, pad)

    out3 = _attention_block_pallas(
        g3, x3,
        wg.T, wx.T,                              # (F_int, F_g), (F_int, F_l)
        (bg + bx).reshape(F_int, 1),             # fused bias
        wpsi.reshape(F_int, 1),
        bpsi.reshape(1),
        tile_hw=tile_hw)

    return out3[:, :, :hw].reshape(N, F_l, H, W)


# --------------------------- pure-JAX reference ---------------------------- #
def attention_block_ref(g, x, params):
    wg, bg = _fold_bn(params["wg"], params["bg"], *params["bn_g"])
    wx, bx = _fold_bn(params["wx"], params["bx"], *params["bn_x"])
    wpsi, bpsi = _fold_bn(params["wpsi"], params["bpsi"], *params["bn_psi"])
    g1 = jnp.einsum("nchw,cf->nfhw", g, wg) + bg[None, :, None, None]
    x1 = jnp.einsum("nchw,cf->nfhw", x, wx) + bx[None, :, None, None]
    t = jnp.maximum(g1 + x1, 0.0)
    psi = jax.nn.sigmoid(jnp.einsum("nfhw,f->nhw", t, wpsi[:, 0]) + bpsi[0])
    return x * psi[:, None, :, :]


# ---------------------------------- main ----------------------------------- #
if __name__ == "__main__":
    key = jax.random.PRNGKey(0)
    N, F_g, F_l, F_int, H, W = 2, 4, 4, 8, 16, 16   # N*H*W = 512 pixels

    ks = jax.random.split(key, 12)
    params = {
        # conv weights stored as (C_in, C_out); biases as (C_out,)
        "wg":   0.2 * jax.random.normal(ks[0], (F_g, F_int), jnp.float32),
        "bg":   0.1 * jax.random.normal(ks[1], (F_int,), jnp.float32),
        "wx":   0.2 * jax.random.normal(ks[2], (F_l, F_int), jnp.float32),
        "bx":   0.1 * jax.random.normal(ks[3], (F_int,), jnp.float32),
        "wpsi": 0.2 * jax.random.normal(ks[4], (F_int, 1), jnp.float32),
        "bpsi": 0.1 * jax.random.normal(ks[5], (1,), jnp.float32),
        # BatchNorm (gamma, beta, running_mean, running_var), eval mode
        "bn_g":   (1.0 + 0.1 * jax.random.normal(ks[6], (F_int,), jnp.float32),
                   0.1 * jax.random.normal(ks[7], (F_int,), jnp.float32),
                   0.05 * jax.random.normal(ks[8], (F_int,), jnp.float32),
                   jnp.abs(1.0 + 0.1 * jax.random.normal(ks[9], (F_int,), jnp.float32))),
        "bn_x":   (jnp.ones((F_int,), jnp.float32),
                   jnp.zeros((F_int,), jnp.float32),
                   jnp.zeros((F_int,), jnp.float32),
                   jnp.ones((F_int,), jnp.float32)),
        "bn_psi": (1.0 + 0.1 * jax.random.normal(ks[10], (1,), jnp.float32),
                   0.1 * jax.random.normal(ks[11], (1,), jnp.float32),
                   jnp.zeros((1,), jnp.float32),
                   jnp.ones((1,), jnp.float32)),
    }
    # TODO(synk): training-mode BatchNorm (batch statistics + running-stat
    # update) is not implemented; eval-mode BN is folded into the convs.

    g_in = jax.random.normal(jax.random.PRNGKey(1), (N, F_g, H, W), jnp.float32)
    x_in = jax.random.normal(jax.random.PRNGKey(2), (N, F_l, H, W), jnp.float32)

    out = jax.block_until_ready(attention_block(g_in, x_in, params))
    ref = jax.block_until_ready(attention_block_ref(g_in, x_in, params))

    assert out.shape == x_in.shape and out.dtype == x_in.dtype
    assert jnp.allclose(out, ref, atol=1e-5, rtol=1e-5), \
        f"max abs err {jnp.max(jnp.abs(out - ref))}"
    print("KERNEL_OK")
</pallas_src>

<mosaic_0001>
module attributes {stable_mosaic.version = 11 : i64} {
  func.func @_attention_block_kernel(%arg0: i32, %arg1: i32, %arg2: memref<1x4x128xf32, #tpu.memory_space<vmem>>, %arg3: memref<1x4x128xf32, #tpu.memory_space<vmem>>, %arg4: memref<8x4xf32, #tpu.memory_space<vmem>>, %arg5: memref<8x4xf32, #tpu.memory_space<vmem>>, %arg6: memref<8x1xf32, #tpu.memory_space<vmem>>, %arg7: memref<8x1xf32, #tpu.memory_space<vmem>>, %arg8: memref<1xf32, #tpu.memory_space<smem>>, %arg9: memref<1x4x128xf32, #tpu.memory_space<vmem>>) attributes {dimension_semantics = [#tpu.dimension_semantics<parallel>, #tpu.dimension_semantics<parallel>], iteration_bounds = array<i64: 2, 2>, scalar_prefetch = 0 : i64, scratch_operands = 0 : i64, tpu.core_type = #tpu.core_type<tc>, window_params = [{transform_indices = @transform_0, window_bounds = array<i64: 1, 4, 128>}, {transform_indices = @transform_1, window_bounds = array<i64: 1, 4, 128>}, {pipeline_mode = #tpu.pipeline_mode<synchronous>, transform_indices = @transform_2, window_bounds = array<i64: 8, 4>}, {pipeline_mode = #tpu.pipeline_mode<synchronous>, transform_indices = @transform_3, window_bounds = array<i64: 8, 4>}, {pipeline_mode = #tpu.pipeline_mode<synchronous>, transform_indices = @transform_4, window_bounds = array<i64: 8, 1>}, {pipeline_mode = #tpu.pipeline_mode<synchronous>, transform_indices = @transform_5, window_bounds = array<i64: 8, 1>}, {transform_indices = @transform_6, window_bounds = array<i64: 1>}, {transform_indices = @transform_7, window_bounds = array<i64: 1, 4, 128>}]} {
    %c0 = arith.constant 0 : index
    %c0_0 = arith.constant 0 : index
    %c0_1 = arith.constant 0 : index
    %0 = vector.load %arg3[%c0, %c0_0, %c0_1] : memref<1x4x128xf32, #tpu.memory_space<vmem>>, vector<1x4x128xf32>
    %1 = vector.shape_cast %0 : vector<1x4x128xf32> to vector<4x128xf32>
    %c0_2 = arith.constant 0 : index
    %c0_3 = arith.constant 0 : index
    %2 = vector.load %arg4[%c0_2, %c0_3] : memref<8x4xf32, #tpu.memory_space<vmem>>, vector<8x4xf32>
    %c0_4 = arith.constant 0 : index
    %c0_5 = arith.constant 0 : index
    %c0_6 = arith.constant 0 : index
    %3 = vector.load %arg2[%c0_4, %c0_5, %c0_6] : memref<1x4x128xf32, #tpu.memory_space<vmem>>, vector<1x4x128xf32>
    %4 = vector.shape_cast %3 : vector<1x4x128xf32> to vector<4x128xf32>
    %cst = arith.constant dense<0.000000e+00> : vector<8x128xf32>
    %5 = tpu.matmul %2, %4, %cst {dimension_numbers = #tpu.dot_dimension_numbers<[1], [0], [0], [1], [0, 0, 1, 1], [], []>} : vector<8x4xf32>, vector<4x128xf32>, vector<8x128xf32> -> vector<8x128xf32>
    %c0_7 = arith.constant 0 : index
    %c0_8 = arith.constant 0 : index
    %6 = vector.load %arg5[%c0_7, %c0_8] : memref<8x4xf32, #tpu.memory_space<vmem>>, vector<8x4xf32>
    %cst_9 = arith.constant dense<0.000000e+00> : vector<8x128xf32>
    %7 = tpu.matmul %6, %1, %cst_9 {dimension_numbers = #tpu.dot_dimension_numbers<[1], [0], [0], [1], [0, 0, 1, 1], [], []>} : vector<8x4xf32>, vector<4x128xf32>, vector<8x128xf32> -> vector<8x128xf32>
    %8 = arith.addf %5, %7 : vector<8x128xf32>
    %c0_10 = arith.constant 0 : index
    %c0_11 = arith.constant 0 : index
    %9 = vector.load %arg6[%c0_10, %c0_11] : memref<8x1xf32, #tpu.memory_space<vmem>>, vector<8x1xf32>
    %10 = vector.broadcast %9 : vector<8x1xf32> to vector<8x128xf32>
    %11 = arith.addf %8, %10 : vector<8x128xf32>
    %cst_12 = arith.constant 0.000000e+00 : f32
    %12 = vector.broadcast %cst_12 : f32 to vector<8x128xf32>
    %13 = arith.maximumf %11, %12 : vector<8x128xf32>
    %c0_13 = arith.constant 0 : index
    %c0_14 = arith.constant 0 : index
    %14 = vector.load %arg7[%c0_13, %c0_14] : memref<8x1xf32, #tpu.memory_space<vmem>>, vector<8x1xf32>
    %15 = vector.broadcast %14 : vector<8x1xf32> to vector<8x128xf32>
    %16 = arith.mulf %13, %15 : vector<8x128xf32>
    %cst_15 = arith.constant dense<0.000000e+00> : vector<128xf32>
    %17 = vector.multi_reduction <add>, %16, %cst_15 [0] : vector<8x128xf32> to vector<128xf32>
    %18 = vector.shape_cast %17 : vector<128xf32> to vector<1x128xf32>
    %c0_16 = arith.constant 0 : index
    %19 = memref.load %arg8[%c0_16] : memref<1xf32, #tpu.memory_space<smem>>
    %20 = vector.broadcast %19 : f32 to vector<1x128xf32>
    %21 = arith.addf %18, %20 : vector<1x128xf32>
    %22 = arith.negf %21 : vector<1x128xf32>
    %23 = math.exp %22 : vector<1x128xf32>
    %cst_17 = arith.constant 1.000000e+00 : f32
    %24 = vector.broadcast %cst_17 : f32 to vector<1x128xf32>
    %25 = arith.addf %24, %23 : vector<1x128xf32>
    %26 = arith.divf %24, %25 : vector<1x128xf32>
    %27 = vector.broadcast %26 : vector<1x128xf32> to vector<4x128xf32>
    %28 = arith.mulf %1, %27 : vector<4x128xf32>
    %c0_18 = arith.constant 0 : index
    %c0_19 = arith.constant 0 : index
    %c0_20 = arith.constant 0 : index
    %29 = vector.load %arg9[%c0_18, %c0_19, %c0_20] : memref<1x4x128xf32, #tpu.memory_space<vmem>>, vector<1x4x128xf32>
    %30 = vector.shape_cast %29 : vector<1x4x128xf32> to vector<4x128xf32>
    %31 = vector.shape_cast %28 : vector<4x128xf32> to vector<1x4x128xf32>
    tpu.vector_store %arg9[%c0_18, %c0_19, %c0_20], %31 {strides = array<i32>} : memref<1x4x128xf32, #tpu.memory_space<vmem>>, vector<1x4x128xf32>,
    return
  }
  func.func @transform_0(%arg0: i32, %arg1: i32) -> (i32, i32, i32) {
    %c0_i32 = arith.constant 0 : i32
    %c0_i32_0 = arith.constant 0 : i32
    return %arg0, %c0_i32, %arg1 : i32, i32, i32
  }
  func.func @transform_1(%arg0: i32, %arg1: i32) -> (i32, i32, i32) {
    %c0_i32 = arith.constant 0 : i32
    %c0_i32_0 = arith.constant 0 : i32
    return %arg0, %c0_i32, %arg1 : i32, i32, i32
  }
  func.func @transform_2(%arg0: i32, %arg1: i32) -> (i32, i32) {
    %c0_i32 = arith.constant 0 : i32
    %c0_i32_0 = arith.constant 0 : i32
    %c0_i32_1 = arith.constant 0 : i32
    return %c0_i32, %c0_i32_0 : i32, i32
  }
  func.func @transform_3(%arg0: i32, %arg1: i32) -> (i32, i32) {
    %c0_i32 = arith.constant 0 : i32
    %c0_i32_0 = arith.constant 0 : i32
    %c0_i32_1 = arith.constant 0 : i32
    return %c0_i32, %c0_i32_0 : i32, i32
  }
  func.func @transform_4(%arg0: i32, %arg1: i32) -> (i32, i32) {
    %c0_i32 = arith.constant 0 : i32
    %c0_i32_0 = arith.constant 0 : i32
    %c0_i32_1 = arith.constant 0 : i32
    return %c0_i32, %c0_i32_0 : i32, i32
  }
  func.func @transform_5(%arg0: i32, %arg1: i32) -> (i32, i32) {
    %c0_i32 = arith.constant 0 : i32
    %c0_i32_0 = arith.constant 0 : i32
    %c0_i32_1 = arith.constant 0 : i32
    return %c0_i32, %c0_i32_0 : i32, i32
  }
  func.func @transform_6(%arg0: i32, %arg1: i32) -> i32 {
    %c0_i32 = arith.constant 0 : i32
    %c0_i32_0 = arith.constant 0 : i32
    return %c0_i32 : i32
  }
  func.func @transform_7(%arg0: i32, %arg1: i32) -> (i32, i32, i32) {
    %c0_i32 = arith.constant 0 : i32
    %c0_i32_0 = arith.constant 0 : i32
    return %arg0, %c0_i32, %arg1 : i32, i32, i32
  }
}

</mosaic_0001>

<bundles_post_ra>
// kernel: tpu_custom_call.1
= control target key start
LH: loop header
LB: loop body
LE: loop exit
PB: predicated region body
PF: predicated region fallthrough
CT: control target
= control target key end

     0   :  { %s1029_s0 = inlined_call_operand.vmem [shape: f32[2,4,256], index: 0, kind: input, shape index: {}]   ;;  %s1030_s1 = inlined_call_operand.vmem [shape: f32[2,4,256], index: 1, kind: input, shape index: {}]   ;;  %s1031_s2 = inlined_call_operand.vmem [shape: f32[8,4], index: 2, kind: input, shape index: {}]   ;;  %s1032_s3 = inlined_call_operand.vmem [shape: f32[8,4], index: 3, kind: input, shape index: {}]   ;;  %s1033_s4 = inlined_call_operand.vmem [shape: f32[8,1], index: 4, kind: input, shape index: {}]   ;;  %s1034_s5 = inlined_call_operand.vmem [shape: f32[8,1], index: 5, kind: input, shape index: {}]   ;;  %s1035_s6 = inlined_call_operand.<no memory space> [shape: f32[1], index: 6, kind: input, shape index: {}]   ;;  %s1036_s7 = inlined_call_operand.hbm [shape: f32[2,4,256], index: 7, kind: output, shape index: {}]  }
   0x1   :  { %1040 = sst [smem:[#allocation9_spill]] %s1033_s4 }
   0x2   :  { %12 = sst [smem:[#allocation2]] %s1035_s6 }
   0x3   :  { %13 = vsyncpa [#allocation4], 0 }
   0x4   :  { %15 = vsyncpa [#allocation4 + $0x1], 0  ;;  %s890_s26 = smov 0   ;;  %s892_s27 = smov 0  }
   0x5   :  { %s894_s28 = smov 0   ;;  %s896_s29 = smov 0  }
   0x6   :  { %s898_s30 = smov 0   ;;  %s900_s8 = smov 0  }
   0x7   :  { %s902_s9 = smov 0   ;;  %s904_s10 = smov 0  }
   0x8 LB: > { %1041 = sst [smem:[#allocation6_spill]] %s837_s9  ;;  %s636_s6 = sadd.s32 4294967295, %s841_s10   ;;  %s841_s10 = sphi %s904_s10, %s21_s10   ;;  %s837_s9 = sphi %s902_s9, %s1049_s9   ;;  %s833_s8 = sphi %s900_s8, %s1054_s8   ;;  %s829_s30 = sphi %s898_s30, %s1047_s30   ;;  %s825_s29 = sphi %s896_s29, %s1053_s29   ;;  %s821_s28 = sphi %s894_s28, %s1052_s28   ;;  %s817_s27 = sphi %s892_s27, %s1051_s27   ;;  %s813_s26 = sphi %s890_s26, %s1050_s26  }
   0x9   : > { %s637_s11 = sadd.s32 4294967294, %s841_s10   ;;  %s30_s12 = sadd.s32 1, %s833_s8 }
   0xa   : > { %p31_p0 = scmp.ge.s32.totalorder %s30_s12, 2  ;;  %s33_s13 = sadd.s32 1, %s837_s9 }
   0xb   : > { %p213_p1 = scmp.ne.s32.totalorder %s821_s28, %s817_s27  ;;  %p214_p2 = scmp.eq.s32.totalorder %s636_s6, 3 }
   0xc   : > { %s1056_s12 = smov (%p31_p0, %s30_s12), 0  ;;  %s1058_s13 = smov (!%p31_p0, %s33_s13), %s837_s9 }
   0xd   : > { %1042 = sst [smem:[#allocation7_spill]] %s1056_s12  ;;  %s199_s14 = ssub.s32 %s833_s8, %s1056_s12 }
   0xe   : > { %p941_p3 = por %p214_p2, %p213_p1  ;;  %p35_p4 = scmp.ge.s32.totalorder %s1058_s13, 2 }
   0xf   : > { %p219_p5 = scmp.ne.s32.totalorder %s817_s27, %s813_s26  ;;  %p220_p6 = scmp.eq.s32.totalorder %s637_s11, 3 }
  0x10   : > { %p640_p7 = scmp.ge.s32.totalorder %s841_s10, 1  ;;  %s1060_s13 = smov (%p35_p4, %s1058_s13), 0 }
  0x11   : > { %1044 = sst [smem:[#allocation8_spill]] %s1060_s13  ;;  %p950_p8 = por %p220_p6, %p219_p5 }
  0x12   : > { %p275_p9 = scmp.lt.s32.totalorder %s841_s10, 5  ;;  %s198_s17 = ssub.s32 %s837_s9, %s1060_s13 }
  0x13   : > { %s203_s18 = sadd.s32 1, %s821_s28  ;;  %s200_s19 = sor.u32 %s199_s14, %s198_s17 }
  0x14   : > { %p276_p10 = pnand %p640_p7, %p275_p9  ;;  %p201_p11 = scmp.eq.s32.totalorder %s200_s19, 0 }
  0x15   : > { %p318_p12 = scmp.lt.s32.totalorder (!%p276_p10), %s829_s30, 1  ;;  %p320_p13 = scmp.lt.s32.totalorder (!%p276_p10), %s825_s29, 1 }
  0x16   : > { %s959_s20 = scalar_select %p201_p11, %s821_s28, %s203_s18  }
  0x17   : > { %279 = sbr.rel (%p276_p10) target bundleno = 299 (0x12b), region = 48  ;;  %s1046_s4 = sld [smem:[#allocation9_spill]] (!%p276_p10) }
  0x18   : > { %s315_s9 = sand.u32 (!%p276_p10), 1, %s817_s27  }
  0x19   : > { %s641_s12 = sshll.u32 (!%p276_p10), %s315_s9, 2 }
  0x1a   : > { %s317_s11 = scalar_lea.vmem (!%p276_p10), [#allocation3], %s641_s12 }
  0x1b   : > { %s540_s14 = sshll.u32 (!%p276_p10), %s317_s11, 4  ;;  %s541_s14 = int_to_ptr.vmem [resolvable:$true] %s540_s14 }
  0x1c   : > { %v843_v0 = vmov 0.0   ;;  %s319_s23 = scalar_select %p318_p12, %s829_s30, 1  ;;  %vm844_vm0 = vmmov 0   ;;  %v845_v2 = vmov 0   ;;  %v500_v3 = vld [vmem:[%s1034_s5] sm:$0xff]  ;;  %vm342_vm1 = vcmask 1043456  }
  0x1d   : > { %660 = vmatprep.subr.mxu0 %v843_v0  ;;  %665 = vmatprep.subr.mxu1 %v843_v0  ;;  %v492_v1 = vld [vmem:[%s1046_s4] sm:$0xff]  ;;  %s321_s24 = scalar_select %p320_p13, %s825_s29, 1  ;;  %vm338_vm2 = vcmask 31744  }
  0x1e   : > { %662 = vmatprep.mubr.msk.f32.mxu0 %vm844_vm0, %v843_v0  ;;  %667 = vmatprep.mubr.msk.f32.mxu1 %vm844_vm0, %v843_v0  ;;  %s642_s25 = sshll.u32 %s319_s23, 1  ;;  %v337_v4 = vld [vmem:[%s1032_s3] sm:$0xff]  ;;  %s513_s4 = sld [smem:[#allocation2]] }
  0x1f   : > { %744 = vset.pattern.permute.xlu0 %v845_v2  ;;  %s323_s6 = sadd.s32 %s642_s25, %s321_s24  ;;  %v335_v5 = vld [vmem:[%s1031_s2] sm:$0xff]  ;;  %s749_s22 = scalar_lea.vmem %s541_s14, 64 }
  0x20   : > { %495 = vperm.xlu0 %744, %v492_v1   ;;  %s643_s17 = sshll.u32 %s323_s6, 2  ;;  %p750_p0 = scmp.ne.s32.totalorder %s541_s14, %s749_s22 }
  0x21   : > { %s333_s21 = scalar_lea.vmem %s1030_s1, %s643_s17  ;;  %s325_s13 = scalar_lea.vmem %s1029_s0, %s643_s17 }
  0x22   : > { %v334_v6 = vld [vmem:[%s333_s21] sm:$0xf]  ;;  %s525_s21 = scalar_lea.sflag [#allocation4], %s315_s9  ;;  %p751_p1 = pnand %p750_p0, %p941_p3 }
  0x23   : > { %v336_v7 = vld [vmem:[%s325_s13] sm:$0xf]  ;;  %661 = vmatpush3.msk.msra.mxu0 %vm342_vm1, %v334_v6  ;;  %s652_s13 = sshll.u32 %s829_s30, 1  ;;  %s846_s23 = smov [#allocation3]  }
  0x24   : > { %503 = vperm.xlu0 %744, %v500_v3   ;;  %666 = vmatpush3.msk.msra.mxu1 %vm342_vm1, %v336_v7  ;;  %v514_v23 = vstv %s513_s4  ;;  %s536_s25 = sadd.s32 %s825_s29, %s652_s13  ;;  %p752_p2 = pneg %p751_p1 }
  0x25   : > { %663 = vmatmul.mubr.msk.f32.vlgmr.msra.gmra.mxu0 %vm338_vm2, %v337_v4  ;;  %668 = vmatmul.mubr.msk.f32.vlgmr.msra.gmra.mxu1 %vm338_vm2, %v335_v5  ;;  %s653_s6 = sshll.u32 %s536_s25, 6  ;;  %s753_s30 = sshll.u32 %s846_s23, 4  ;;  %s754_s30 = int_to_ptr.vmem [resolvable:$false] %s753_s30 }
  0x26   : > { %s538_s19 = scalar_lea.hbm %s1036_s7, %s653_s6  ;;  %s755_s29 = scalar_lea.vmem %s754_s30, 128 }
  0x27   : > { %p756_p4 = scmp.lt.s32.totalorder %s541_s14, %s754_s30  ;;  %p757_p5 = scmp.lt.s32.totalorder %s755_s29, %s749_s22 }
  0x29   : > { %p758_p6 = por %p757_p5, %p756_p4 }
  0x2b   : > { %p759_p7 = pnand %p758_p6, %p752_p2 }
  0x9b   : > { %v496_v8 = vpop.permute.xlu0 %495 }
  0x9f   : > { %v504_v16 = vpop.permute.xlu0 %503 }
  0xe5   : > { %v412_v9 = vpop.f32.mrf.mxu0  ;;  %v488_v10 = vpop.f32.mrf.mxu1 }
  0xe6   : > { %v489_v11 = vadd.f32 %v488_v10, %v412_v9 }
  0xe7   : > { %v664_v12 = vpop.f32.mrf.mxu0  ;;  %v669_v13 = vpop.f32.mrf.mxu1 }
  0xe8   : > { %v498_v14 = vadd.f32 %v496_v8, %v489_v11 }
  0xea   : > { %v499_v15 = vmax.f32 %v498_v14, 0.0 }
  0xec   : > { %v506_v17 = vmul.f32 %v504_v16, %v499_v15 }
  0xee   : > { %v507_v18 = vrot.slane %v506_v17, 4 }
  0xf0   : > { %v508_v19 = vadd.f32 %v507_v18, %v506_v17 }
  0xf2   : > { %v509_v20 = vrot.slane %v508_v19, 2 }
  0xf4   : > { %v510_v21 = vadd.f32 %v509_v20, %v508_v19 }
  0xf6   : > { %v511_v22 = vrot.slane %v510_v21, 1 }
  0xf8   : > { %v512_v24 = vadd.f32 %v511_v22, %v510_v21 }
  0xfa   : > { %v515_v25 = vadd.f32 %v514_v23, %v512_v24 }
  0xfc   : > { %v650_v26 = vmul.f32 -1.442695, %v515_v25 }
  0xfe   : > { %745 = vpow2.f32 %v650_v26 }
 0x10b   : > { %v746_v27 = vpop.eup %745 }
 0x10c   : > { %v519_v28 = vadd.f32 1.0, %v746_v27 }
 0x10e   : > { %747 = vrcp.f32 %v519_v28 }
 0x11b   : > { %v748_v29 = vpop.eup %747 }
 0x11c   : > { %v522_v30 = vmul.f32 %v748_v29, %v334_v6 }
 0x11e   : > { %523 = vst [vmem:[%s317_s11] sm:$0xf] %v522_v30 }
 0x11f   : > { %762 = shalt.err (!%p759_p7)
}
 0x120   : > { %s763_s24 = scalar_lea.hbm %s538_s19, 64  ;;  %s767_s12 = scalar_lea.hbm %s1036_s7, 256 }
 0x121   : > { %p764_p9 = scmp.ne.s32.totalorder %s538_s19, %s763_s24  ;;  %p768_p12 = scmp.lt.s32.totalorder %s538_s19, %s1036_s7 }
 0x122   : > { %p769_p13 = scmp.lt.s32.totalorder %s767_s12, %s763_s24 }
 0x123   : > { %p765_p10 = pnand %p764_p9, %p941_p3 }
 0x124   : > { %p770_p0 = por %p769_p13, %p768_p12 }
 0x125   : > { %p766_p11 = pneg %p765_p10 }
 0x127   : > { %p771_p1 = pnand %p770_p0, %p766_p11 }
 0x129   : > { %774 = shalt.err (!%p771_p1)
}
 0x12a   : > { %670 = dma.vmem_to_hbm [thread:$0]  (%p941_p3), %s541_s14, 64, %s538_s19, %s525_s21  }
 0x12b PF: > { %p676_p2 = scmp.ge.s32.totalorder %s841_s10, 2  ;;  %s552_s6 = sand.u32 1, %s813_s26  }
 0x12c   : > { %s553_s11 = scalar_lea.sflag [#allocation4], %s552_s6 }
 0x12d   : > { %p673_p4 = pnand %p676_p2, %p950_p8 }
 0x12f   : > { %p674_p5 = pneg %p673_p4 }
 0x131   : > { %808 = dma.done.wait (%p674_p5), %s553_s11, 64  }
 0x132   : > { %810 = vsyncadd (%p674_p5), %s553_s11, 4294967232  ;;  %s21_s10 = sadd.s32 1, %s841_s10   ;;  %s1047_s30 = sld [smem:[#allocation6_spill]] }
 0x133   : > { %p18_p6 = scmp.ge.s32.totalorder %s21_s10, 6   ;;  %s1048_s15 = sld [smem:[#allocation7_spill]] }
 0x134   : > { %s1049_s9 = sld [smem:[#allocation8_spill]]  ;;  %s1050_s26 = smov %s817_s27 }
 0x135   : > { %s1051_s27 = smov %s821_s28  ;;  %s1052_s28 = smov %s959_s20 }
 0x136   : > { %s1053_s29 = smov %s833_s8  ;;  %20 = sbr.rel (!%p18_p6) target bundleno = 8 (0x8), region = 86 }
 0x139   : > { %s1054_s8 = smov %s1048_s15 }
 0x13b   :  { %558 = vsyncpa [#allocation4], 1 }
 0x13c   :  { %560 = vsyncpa [#allocation4 + $0x1], 1 }

</bundles_post_ra>
